<compile_context>
chip_gen: v5e
topology: v5e:2x2
jax: 0.10.0
libtpu: 0.0.40
codegen_flags: <defaults>
</compile_context>

<pallas_src>
import numpy as np
import jax
import jax.numpy as jnp
from jax.experimental import pallas as pl
from jax.experimental.pallas import tpu as pltpu

# ---- problem sizes (small, consistent with the module) ----------------------
BATCH = 2
EMBED_DIM = 32          # C
SEQ_LEN = 16            # L  (sequence_length)
NUM_HEADS = 4
OUTPUT_DIM = 32         # output_dim (defaults to embed_dim)
S = SEQ_LEN + 1         # tokens after prepending the mean token
HEAD_DIM = EMBED_DIM // NUM_HEADS
PAD = 128               # lane-group width for the Q / K / V column groups


def _attn_pool_kernel(x_ref, w_all_ref, qkv_c_ref, hm_ref, hmt_ref,
                      wc_ref, bc_ref, o_ref):
    """Single grid step, whole batch.

    x_ref     : (B, C, L)     input in its native channel-first layout
    w_all_ref : (C, 3*PAD)    [Wq.T*scale | 0pad | Wk.T | 0pad | Wv.T | 0pad]
    qkv_c_ref : (S, 3*PAD)    pos @ w_all + [bq*scale | bk | bv], lane-padded
    hm_ref    : (PAD, H)      head mask (channel -> head), pad rows are zero
    hmt_ref   : (H, PAD)      its transpose (precomputed, no in-kernel transpose)
    wc_ref    : (PAD, Dout)   output projection, pad rows are zero
    bc_ref    : (1, Dout)
    o_ref     : (B, Dout)
    """
    f32 = jnp.float32
    w_all = w_all_ref[...]                                  # (C, 3P)
    qkv_c = qkv_c_ref[...]                                  # (S, 3P)
    hm = hm_ref[...]                                        # (P, H)
    hmt = hmt_ref[...]                                      # (H, P)
    wc = wc_ref[...]                                        # (P, D)
    bc = bc_ref[...]                                        # (1, D)

    outs = []
    for b in range(BATCH):                                  # static, B is tiny
        # ---- token build: transpose + mean + prepend (XLU only, no matmul) --
        xb = x_ref[b]                                       # (C, L)
        xt = xb.T                                           # (L, C) XLU transpose
        mean_row = jnp.mean(xt, axis=0, keepdims=True)      # (1, C)
        tok_x = jnp.concatenate([mean_row, xt], axis=0)     # (S, C)

        # ---- fused QKV projection; pos-emb + bias folded into qkv_c ---------
        qkv = jnp.dot(tok_x, w_all,
                      preferred_element_type=f32) + qkv_c   # (S, 3P)
        q = qkv[0:1, 0:PAD]            # query = mean-token row only   (1, P)
        k = qkv[:, PAD:2 * PAD]                                        # (S, P)
        v = qkv[:, 2 * PAD:3 * PAD]                                    # (S, P)

        # ---- per-head scores + softmax over the S key rows ------------------
        scores = jnp.dot(q * k, hm, preferred_element_type=f32)       # (S, H)
        m = jnp.max(scores, axis=0, keepdims=True)                    # (1, H)
        p = jnp.exp(scores - m)                                       # (S, H)
        denom = jnp.sum(p, axis=0, keepdims=True)                     # (1, H)
        p = p * pl.reciprocal(denom, approx=False)                    # (S, H)

        # ---- weighted values + output projection ----------------------------
        p_full = jnp.dot(p, hmt, preferred_element_type=f32)          # (S, P)
        attn = jnp.sum(p_full * v, axis=0, keepdims=True)             # (1, P)
        outs.append(jnp.dot(attn, wc,
                            preferred_element_type=f32) + bc)         # (1, D)

    o_ref[...] = jnp.concatenate(outs, axis=0)              # single (B, D) store


def prepare_params(params):
    """One-time weight prep: fuse QKV, fold scale / pos-emb / biases, pad lanes."""
    C, D, H = EMBED_DIM, OUTPUT_DIM, NUM_HEADS
    scale = 1.0 / (HEAD_DIM ** 0.5)

    def pad_cols(a):                       # (..., C) -> (..., PAD)
        return jnp.pad(a.astype(jnp.float32), ((0, 0), (0, PAD - C)))

    # Fused projection weight, 1/sqrt(head_dim) folded into the Q group,
    # each group zero-padded to a full 128-lane vreg group.
    w_all = jnp.concatenate([pad_cols(params["wq"].T * scale),
                             pad_cols(params["wk"].T),
                             pad_cols(params["wv"].T)], axis=1)         # (C, 3P)

    # Positional-embedding + bias contribution to Q/K/V, same padded layout.
    pos = params["pos_emb"].astype(jnp.float32)                          # (S, C)
    q_c = (pos @ params["wq"].T + params["bq"]) * scale
    k_c = pos @ params["wk"].T + params["bk"]
    v_c = pos @ params["wv"].T + params["bv"]
    qkv_const = jnp.concatenate([pad_cols(q_c), pad_cols(k_c),
                                 pad_cols(v_c)], axis=1)                 # (S, 3P)

    # Head masks precomputed on host (no in-kernel iota / div / transpose).
    ids = np.arange(PAD)
    hm_np = ((ids[:, None] // HEAD_DIM) == np.arange(H)[None, :]) \
        & (ids[:, None] < C)
    head_mask = jnp.asarray(hm_np, dtype=jnp.float32)                   # (P, H)
    head_mask_t = jnp.asarray(hm_np.T, dtype=jnp.float32)               # (H, P)

    wc_pad = jnp.pad(params["wc"].T.astype(jnp.float32),
                     ((0, PAD - C), (0, 0)))                             # (P, D)
    bc = params["bc"].reshape(1, D).astype(jnp.float32)

    return {"w_all": w_all, "qkv_const": qkv_const,
            "head_mask": head_mask, "head_mask_t": head_mask_t,
            "wc_pad": wc_pad, "bc": bc}


def attention_pool_1d(x, prep):
    """x: (B, C, L) channel-first, float32. Returns (B, output_dim)."""
    B, C, L = x.shape
    assert B == BATCH and C == EMBED_DIM and L == SEQ_LEN

    f3 = lambda i: (0, 0, 0)
    f2 = lambda i: (0, 0)
    out = pl.pallas_call(
        _attn_pool_kernel,
        out_shape=jax.ShapeDtypeStruct((B, OUTPUT_DIM), jnp.float32),
        grid_spec=pltpu.PrefetchScalarGridSpec(
            num_scalar_prefetch=0,
            grid=(1,),                                    # single step
            in_specs=[
                pl.BlockSpec((B, C, L), f3),              # x, native layout
                pl.BlockSpec((C, 3 * PAD), f2),           # fused qkv weight
                pl.BlockSpec((S, 3 * PAD), f2),           # pos-emb/bias constant
                pl.BlockSpec((PAD, NUM_HEADS), f2),       # head mask
                pl.BlockSpec((NUM_HEADS, PAD), f2),       # head mask (transposed)
                pl.BlockSpec((PAD, OUTPUT_DIM), f2),      # output projection
                pl.BlockSpec((1, OUTPUT_DIM), f2),        # output bias
            ],
            out_specs=pl.BlockSpec((B, OUTPUT_DIM), f2),
        ),
        compiler_params=pltpu.CompilerParams(
            dimension_semantics=("arbitrary",)),
    )(x, prep["w_all"], prep["qkv_const"], prep["head_mask"],
      prep["head_mask_t"], prep["wc_pad"], prep["bc"])

    return out                                            # (B, Dout)


def attention_pool_1d_ref(x, params, num_heads=NUM_HEADS):
    """Pure-JAX reference mirroring F.multi_head_attention_forward semantics."""
    B, C, L = x.shape
    tok = jnp.transpose(x, (0, 2, 1))
    mean = jnp.mean(tok, axis=1, keepdims=True)
    tok = jnp.concatenate([mean, tok], axis=1) + params["pos_emb"][None]
    q = tok[:, 0:1] @ params["wq"].T + params["bq"]
    k = tok @ params["wk"].T + params["bk"]
    v = tok @ params["wv"].T + params["bv"]
    dh = C // num_heads
    qh = q.reshape(B, 1, num_heads, dh)
    kh = k.reshape(B, -1, num_heads, dh)
    vh = v.reshape(B, -1, num_heads, dh)
    scores = jnp.einsum("bqhd,bkhd->bhqk", qh, kh) / jnp.sqrt(dh)
    p = jax.nn.softmax(scores, axis=-1)
    oh = jnp.einsum("bhqk,bkhd->bqhd", p, vh).reshape(B, 1, C)
    out = oh @ params["wc"].T + params["bc"]
    return out[:, 0]


def init_params(key):
    ks = jax.random.split(key, 9)
    C, D = EMBED_DIM, OUTPUT_DIM
    return {
        "pos_emb": jax.random.normal(ks[0], (S, C), jnp.float32) / (C ** 0.5),
        "wq": jax.random.normal(ks[1], (C, C), jnp.float32) * 0.05,
        "bq": jax.random.normal(ks[2], (C,), jnp.float32) * 0.01,
        "wk": jax.random.normal(ks[3], (C, C), jnp.float32) * 0.05,
        "bk": jax.random.normal(ks[4], (C,), jnp.float32) * 0.01,
        "wv": jax.random.normal(ks[5], (C, C), jnp.float32) * 0.05,
        "bv": jax.random.normal(ks[6], (C,), jnp.float32) * 0.01,
        "wc": jax.random.normal(ks[7], (D, C), jnp.float32) * 0.05,
        "bc": jax.random.normal(ks[8], (D,), jnp.float32) * 0.01,
    }


if __name__ == "__main__":
    key = jax.random.PRNGKey(0)
    k_x, k_p = jax.random.split(key)
    x = jax.random.normal(k_x, (BATCH, EMBED_DIM, SEQ_LEN), jnp.float32)
    params = init_params(k_p)
    prep = prepare_params(params)        # one-time: fuse QKV, fold scale/pos/bias

    out = attention_pool_1d(x, prep)
    out = jax.block_until_ready(out)

    ref = attention_pool_1d_ref(x, params)
    assert out.shape == (BATCH, OUTPUT_DIM), out.shape
    assert jnp.allclose(out, ref, rtol=1e-4, atol=1e-4), (
        float(jnp.max(jnp.abs(out - ref))))

    print("KERNEL_OK")
</pallas_src>

<mosaic_0001>
module attributes {stable_mosaic.version = 11 : i64} {
  func.func @_attn_pool_kernel(%arg0: i32, %arg1: memref<2x32x16xf32, #tpu.memory_space<vmem>>, %arg2: memref<32x384xf32, #tpu.memory_space<vmem>>, %arg3: memref<17x384xf32, #tpu.memory_space<vmem>>, %arg4: memref<128x4xf32, #tpu.memory_space<vmem>>, %arg5: memref<4x128xf32, #tpu.memory_space<vmem>>, %arg6: memref<128x32xf32, #tpu.memory_space<vmem>>, %arg7: memref<1x32xf32, #tpu.memory_space<vmem>>, %arg8: memref<2x32xf32, #tpu.memory_space<vmem>>) attributes {dimension_semantics = [#tpu.dimension_semantics<arbitrary>], iteration_bounds = array<i64: 1>, scalar_prefetch = 0 : i64, scratch_operands = 0 : i64, tpu.core_type = #tpu.core_type<tc>, window_params = [{pipeline_mode = #tpu.pipeline_mode<synchronous>, transform_indices = @transform_0, window_bounds = array<i64: 2, 32, 16>}, {pipeline_mode = #tpu.pipeline_mode<synchronous>, transform_indices = @transform_1, window_bounds = array<i64: 32, 384>}, {pipeline_mode = #tpu.pipeline_mode<synchronous>, transform_indices = @transform_2, window_bounds = array<i64: 17, 384>}, {pipeline_mode = #tpu.pipeline_mode<synchronous>, transform_indices = @transform_3, window_bounds = array<i64: 128, 4>}, {pipeline_mode = #tpu.pipeline_mode<synchronous>, transform_indices = @transform_4, window_bounds = array<i64: 4, 128>}, {pipeline_mode = #tpu.pipeline_mode<synchronous>, transform_indices = @transform_5, window_bounds = array<i64: 128, 32>}, {pipeline_mode = #tpu.pipeline_mode<synchronous>, transform_indices = @transform_6, window_bounds = array<i64: 1, 32>}, {pipeline_mode = #tpu.pipeline_mode<synchronous>, transform_indices = @transform_7, window_bounds = array<i64: 2, 32>}]} {
    %c0 = arith.constant 0 : index
    %c0_0 = arith.constant 0 : index
    %0 = vector.load %arg2[%c0, %c0_0] : memref<32x384xf32, #tpu.memory_space<vmem>>, vector<32x384xf32>
    %c0_1 = arith.constant 0 : index
    %c0_2 = arith.constant 0 : index
    %1 = vector.load %arg3[%c0_1, %c0_2] : memref<17x384xf32, #tpu.memory_space<vmem>>, vector<17x384xf32>
    %c0_3 = arith.constant 0 : index
    %c0_4 = arith.constant 0 : index
    %2 = vector.load %arg4[%c0_3, %c0_4] : memref<128x4xf32, #tpu.memory_space<vmem>>, vector<128x4xf32>
    %c0_5 = arith.constant 0 : index
    %c0_6 = arith.constant 0 : index
    %3 = vector.load %arg5[%c0_5, %c0_6] : memref<4x128xf32, #tpu.memory_space<vmem>>, vector<4x128xf32>
    %c0_7 = arith.constant 0 : index
    %c0_8 = arith.constant 0 : index
    %4 = vector.load %arg6[%c0_7, %c0_8] : memref<128x32xf32, #tpu.memory_space<vmem>>, vector<128x32xf32>
    %c0_9 = arith.constant 0 : index
    %c0_10 = arith.constant 0 : index
    %5 = vector.load %arg7[%c0_9, %c0_10] : memref<1x32xf32, #tpu.memory_space<vmem>>, vector<1x32xf32>
    %c0_11 = arith.constant 0 : index
    %c0_12 = arith.constant 0 : index
    %c0_13 = arith.constant 0 : index
    %6 = vector.load %arg1[%c0_11, %c0_12, %c0_13] : memref<2x32x16xf32, #tpu.memory_space<vmem>>, vector<1x32x16xf32>
    %7 = vector.shape_cast %6 : vector<1x32x16xf32> to vector<32x16xf32>
    %8 = tpu.transpose %7, [1, 0] : vector<32x16xf32> -> vector<16x32xf32>
    %cst = arith.constant dense<0.000000e+00> : vector<32xf32>
    %9 = vector.multi_reduction <add>, %8, %cst [0] : vector<16x32xf32> to vector<32xf32>
    %10 = vector.shape_cast %9 : vector<32xf32> to vector<1x32xf32>
    %cst_14 = arith.constant 1.600000e+01 : f32
    %11 = vector.broadcast %cst_14 : f32 to vector<1x32xf32>
    %12 = arith.divf %10, %11 : vector<1x32xf32>
    %13 = tpu.concatenate %12, %8 in 0 : vector<1x32xf32>, vector<16x32xf32> -> vector<17x32xf32>
    %cst_15 = arith.constant dense<0.000000e+00> : vector<17x384xf32>
    %14 = tpu.matmul %13, %0, %cst_15 {dimension_numbers = #tpu.dot_dimension_numbers<[1], [0], [0], [1], [0, 0, 1, 1], [], []>} : vector<17x32xf32>, vector<32x384xf32>, vector<17x384xf32> -> vector<17x384xf32>
    %15 = arith.addf %14, %1 : vector<17x384xf32>
    %16 = vector.extract_strided_slice %15 {offsets = [0, 0], sizes = [1, 128], strides = [1, 1]} : vector<17x384xf32> to vector<1x128xf32>
    %17 = vector.extract_strided_slice %15 {offsets = [0, 128], sizes = [17, 128], strides = [1, 1]} : vector<17x384xf32> to vector<17x128xf32>
    %18 = vector.extract_strided_slice %15 {offsets = [0, 256], sizes = [17, 128], strides = [1, 1]} : vector<17x384xf32> to vector<17x128xf32>
    %19 = vector.broadcast %16 : vector<1x128xf32> to vector<17x128xf32>
    %20 = arith.mulf %19, %17 : vector<17x128xf32>
    %cst_16 = arith.constant dense<0.000000e+00> : vector<17x4xf32>
    %21 = tpu.matmul %20, %2, %cst_16 {dimension_numbers = #tpu.dot_dimension_numbers<[1], [0], [0], [1], [0, 0, 1, 1], [], []>} : vector<17x128xf32>, vector<128x4xf32>, vector<17x4xf32> -> vector<17x4xf32>
    %cst_17 = arith.constant dense<0xFF800000> : vector<4xf32>
    %22 = vector.multi_reduction <maximumf>, %21, %cst_17 [0] : vector<17x4xf32> to vector<4xf32>
    %23 = vector.shape_cast %22 : vector<4xf32> to vector<1x4xf32>
    %24 = vector.broadcast %23 : vector<1x4xf32> to vector<17x4xf32>
    %25 = arith.subf %21, %24 : vector<17x4xf32>
    %26 = math.exp %25 : vector<17x4xf32>
    %cst_18 = arith.constant dense<0.000000e+00> : vector<4xf32>
    %27 = vector.multi_reduction <add>, %26, %cst_18 [0] : vector<17x4xf32> to vector<4xf32>
    %28 = vector.shape_cast %27 : vector<4xf32> to vector<1x4xf32>
    %29 = tpu.reciprocal %28 : vector<1x4xf32> -> vector<1x4xf32>
    %30 = vector.broadcast %29 : vector<1x4xf32> to vector<17x4xf32>
    %31 = arith.mulf %26, %30 : vector<17x4xf32>
    %cst_19 = arith.constant dense<0.000000e+00> : vector<17x128xf32>
    %32 = tpu.matmul %31, %3, %cst_19 {dimension_numbers = #tpu.dot_dimension_numbers<[1], [0], [0], [1], [0, 0, 1, 1], [], []>} : vector<17x4xf32>, vector<4x128xf32>, vector<17x128xf32> -> vector<17x128xf32>
    %33 = arith.mulf %32, %18 : vector<17x128xf32>
    %cst_20 = arith.constant dense<0.000000e+00> : vector<128xf32>
    %34 = vector.multi_reduction <add>, %33, %cst_20 [0] : vector<17x128xf32> to vector<128xf32>
    %35 = vector.shape_cast %34 : vector<128xf32> to vector<1x128xf32>
    %cst_21 = arith.constant dense<0.000000e+00> : vector<1x32xf32>
    %36 = tpu.matmul %35, %4, %cst_21 {dimension_numbers = #tpu.dot_dimension_numbers<[1], [0], [0], [1], [0, 0, 1, 1], [], []>} : vector<1x128xf32>, vector<128x32xf32>, vector<1x32xf32> -> vector<1x32xf32>
    %37 = arith.addf %36, %5 : vector<1x32xf32>
    %c1 = arith.constant 1 : index
    %c0_22 = arith.constant 0 : index
    %c0_23 = arith.constant 0 : index
    %38 = vector.load %arg1[%c1, %c0_22, %c0_23] : memref<2x32x16xf32, #tpu.memory_space<vmem>>, vector<1x32x16xf32>
    %39 = vector.shape_cast %38 : vector<1x32x16xf32> to vector<32x16xf32>
    %40 = tpu.transpose %39, [1, 0] : vector<32x16xf32> -> vector<16x32xf32>
    %cst_24 = arith.constant dense<0.000000e+00> : vector<32xf32>
    %41 = vector.multi_reduction <add>, %40, %cst_24 [0] : vector<16x32xf32> to vector<32xf32>
    %42 = vector.shape_cast %41 : vector<32xf32> to vector<1x32xf32>
    %cst_25 = arith.constant 1.600000e+01 : f32
    %43 = vector.broadcast %cst_25 : f32 to vector<1x32xf32>
    %44 = arith.divf %42, %43 : vector<1x32xf32>
    %45 = tpu.concatenate %44, %40 in 0 : vector<1x32xf32>, vector<16x32xf32> -> vector<17x32xf32>
    %cst_26 = arith.constant dense<0.000000e+00> : vector<17x384xf32>
    %46 = tpu.matmul %45, %0, %cst_26 {dimension_numbers = #tpu.dot_dimension_numbers<[1], [0], [0], [1], [0, 0, 1, 1], [], []>} : vector<17x32xf32>, vector<32x384xf32>, vector<17x384xf32> -> vector<17x384xf32>
    %47 = arith.addf %46, %1 : vector<17x384xf32>
    %48 = vector.extract_strided_slice %47 {offsets = [0, 0], sizes = [1, 128], strides = [1, 1]} : vector<17x384xf32> to vector<1x128xf32>
    %49 = vector.extract_strided_slice %47 {offsets = [0, 128], sizes = [17, 128], strides = [1, 1]} : vector<17x384xf32> to vector<17x128xf32>
    %50 = vector.extract_strided_slice %47 {offsets = [0, 256], sizes = [17, 128], strides = [1, 1]} : vector<17x384xf32> to vector<17x128xf32>
    %51 = vector.broadcast %48 : vector<1x128xf32> to vector<17x128xf32>
    %52 = arith.mulf %51, %49 : vector<17x128xf32>
    %cst_27 = arith.constant dense<0.000000e+00> : vector<17x4xf32>
    %53 = tpu.matmul %52, %2, %cst_27 {dimension_numbers = #tpu.dot_dimension_numbers<[1], [0], [0], [1], [0, 0, 1, 1], [], []>} : vector<17x128xf32>, vector<128x4xf32>, vector<17x4xf32> -> vector<17x4xf32>
    %cst_28 = arith.constant dense<0xFF800000> : vector<4xf32>
    %54 = vector.multi_reduction <maximumf>, %53, %cst_28 [0] : vector<17x4xf32> to vector<4xf32>
    %55 = vector.shape_cast %54 : vector<4xf32> to vector<1x4xf32>
    %56 = vector.broadcast %55 : vector<1x4xf32> to vector<17x4xf32>
    %57 = arith.subf %53, %56 : vector<17x4xf32>
    %58 = math.exp %57 : vector<17x4xf32>
    %cst_29 = arith.constant dense<0.000000e+00> : vector<4xf32>
    %59 = vector.multi_reduction <add>, %58, %cst_29 [0] : vector<17x4xf32> to vector<4xf32>
    %60 = vector.shape_cast %59 : vector<4xf32> to vector<1x4xf32>
    %61 = tpu.reciprocal %60 : vector<1x4xf32> -> vector<1x4xf32>
    %62 = vector.broadcast %61 : vector<1x4xf32> to vector<17x4xf32>
    %63 = arith.mulf %58, %62 : vector<17x4xf32>
    %cst_30 = arith.constant dense<0.000000e+00> : vector<17x128xf32>
    %64 = tpu.matmul %63, %3, %cst_30 {dimension_numbers = #tpu.dot_dimension_numbers<[1], [0], [0], [1], [0, 0, 1, 1], [], []>} : vector<17x4xf32>, vector<4x128xf32>, vector<17x128xf32> -> vector<17x128xf32>
    %65 = arith.mulf %64, %50 : vector<17x128xf32>
    %cst_31 = arith.constant dense<0.000000e+00> : vector<128xf32>
    %66 = vector.multi_reduction <add>, %65, %cst_31 [0] : vector<17x128xf32> to vector<128xf32>
    %67 = vector.shape_cast %66 : vector<128xf32> to vector<1x128xf32>
    %cst_32 = arith.constant dense<0.000000e+00> : vector<1x32xf32>
    %68 = tpu.matmul %67, %4, %cst_32 {dimension_numbers = #tpu.dot_dimension_numbers<[1], [0], [0], [1], [0, 0, 1, 1], [], []>} : vector<1x128xf32>, vector<128x32xf32>, vector<1x32xf32> -> vector<1x32xf32>
    %69 = arith.addf %68, %5 : vector<1x32xf32>
    %70 = tpu.concatenate %37, %69 in 0 : vector<1x32xf32>, vector<1x32xf32> -> vector<2x32xf32>
    %c0_33 = arith.constant 0 : index
    %c0_34 = arith.constant 0 : index
    %71 = vector.load %arg8[%c0_33, %c0_34] : memref<2x32xf32, #tpu.memory_space<vmem>>, vector<2x32xf32>
    tpu.vector_store %arg8[%c0_33, %c0_34], %70 {strides = array<i32>} : memref<2x32xf32, #tpu.memory_space<vmem>>, vector<2x32xf32>,
    return
  }
  func.func @transform_0(%arg0: i32) -> (i32, i32, i32) {
    %c0_i32 = arith.constant 0 : i32
    %c0_i32_0 = arith.constant 0 : i32
    %c0_i32_1 = arith.constant 0 : i32
    %c0_i32_2 = arith.constant 0 : i32
    return %c0_i32, %c0_i32_0, %c0_i32_1 : i32, i32, i32
  }
  func.func @transform_1(%arg0: i32) -> (i32, i32) {
    %c0_i32 = arith.constant 0 : i32
    %c0_i32_0 = arith.constant 0 : i32
    %c0_i32_1 = arith.constant 0 : i32
    return %c0_i32, %c0_i32_0 : i32, i32
  }
  func.func @transform_2(%arg0: i32) -> (i32, i32) {
    %c0_i32 = arith.constant 0 : i32
    %c0_i32_0 = arith.constant 0 : i32
    %c0_i32_1 = arith.constant 0 : i32
    return %c0_i32, %c0_i32_0 : i32, i32
  }
  func.func @transform_3(%arg0: i32) -> (i32, i32) {
    %c0_i32 = arith.constant 0 : i32
    %c0_i32_0 = arith.constant 0 : i32
    %c0_i32_1 = arith.constant 0 : i32
    return %c0_i32, %c0_i32_0 : i32, i32
  }
  func.func @transform_4(%arg0: i32) -> (i32, i32) {
    %c0_i32 = arith.constant 0 : i32
    %c0_i32_0 = arith.constant 0 : i32
    %c0_i32_1 = arith.constant 0 : i32
    return %c0_i32, %c0_i32_0 : i32, i32
  }
  func.func @transform_5(%arg0: i32) -> (i32, i32) {
    %c0_i32 = arith.constant 0 : i32
    %c0_i32_0 = arith.constant 0 : i32
    %c0_i32_1 = arith.constant 0 : i32
    return %c0_i32, %c0_i32_0 : i32, i32
  }
  func.func @transform_6(%arg0: i32) -> (i32, i32) {
    %c0_i32 = arith.constant 0 : i32
    %c0_i32_0 = arith.constant 0 : i32
    %c0_i32_1 = arith.constant 0 : i32
    return %c0_i32, %c0_i32_0 : i32, i32
  }
  func.func @transform_7(%arg0: i32) -> (i32, i32) {
    %c0_i32 = arith.constant 0 : i32
    %c0_i32_0 = arith.constant 0 : i32
    %c0_i32_1 = arith.constant 0 : i32
    return %c0_i32, %c0_i32_0 : i32, i32
  }
}

</mosaic_0001>

<bundles_post_ra>
// kernel: tpu_custom_call.1
= control target key start
LH: loop header
LB: loop body
LE: loop exit
PB: predicated region body
PF: predicated region fallthrough
CT: control target
= control target key end

     0   :  { %s1127_s0 = inlined_call_operand.vmem [shape: f32[2,32,16], index: 0, kind: input, shape index: {}]   ;;  %s1128_s1 = inlined_call_operand.vmem [shape: f32[32,384], index: 1, kind: input, shape index: {}]   ;;  %s1129_s2 = inlined_call_operand.vmem [shape: f32[17,384], index: 2, kind: input, shape index: {}]   ;;  %s1130_s3 = inlined_call_operand.vmem [shape: f32[128,4], index: 3, kind: input, shape index: {}]   ;;  %s1131_s4 = inlined_call_operand.vmem [shape: f32[4,128], index: 4, kind: input, shape index: {}]   ;;  %s1132_s5 = inlined_call_operand.vmem [shape: f32[128,32], index: 5, kind: input, shape index: {}]   ;;  %s1133_s6 = inlined_call_operand.vmem [shape: f32[1,32], index: 6, kind: input, shape index: {}]   ;;  %s1134_s7 = inlined_call_operand.hbm [shape: f32[2,32], index: 7, kind: output, shape index: {}]  }
   0x1   :  { %v80_v0 = vld [vmem:[%s1127_s0] sm:$0xff] }
   0x2   :  { %84 = vxpose.xlu0.b32.start [1/4] (short) (narrow) %v80_v0, 16 }
   0x3   :  { %12 = vsyncpa [#allocation3], 0  ;;  %v81_v1 = vld [vmem:[%s1127_s0 + $0x8] sm:$0xff]  ;;  %v82_v2 = vld [vmem:[%s1127_s0 + $0x10] sm:$0xff]  ;;  %v757_v16 = vmov 16.0   ;;  %vm116_vm0 = vcmask 261120  }
   0x4   :  { %v83_v3 = vld [vmem:[%s1127_s0 + $0x18] sm:$0xff]  ;;  %v36_v4 = vld [vmem:[%s1128_s1 + $0x48] sm:$0xff]  ;;  %v817_v5 = vld [vmem:[%s1128_s1 + $0x50] sm:$0xff]  ;;  %713 = vrcp.f32 %v757_v16  ;;  %vm136_vm2 = vcmask 1040384   ;;  %vm255_vm3 = vcmask 31744   ;;  %vm258_vm4 = vcmask 24576  }
   0x5   :  { %v822_v6 = vld [vmem:[%s1128_s1 + $0x58] sm:$0xff]  ;;  %161 = vmatpush.msra.mxu0 %v36_v4  ;;  %185 = vmatpush.msra.mxu1 %v817_v5  ;;  %v33_v7 = vld [vmem:[%s1128_s1 + $0x30] sm:$0xff]  ;;  %v837_v9 = vld [vmem:[%s1128_s1 + $0x40] sm:$0xff]  ;;  %vm314_vm5 = vcmask 1043456   ;;  %s758_s19 = smov [#allocation2]   ;;  %s671_s22 = sshll.u32 %s1134_s7, 4  ;;  %s672_s22 = int_to_ptr.hbm [resolvable:$true] %s671_s22 }
   0x6   :  { %211 = vmatpush.msra.mxu2 %v822_v6  ;;  %v832_v8 = vld [vmem:[%s1128_s1 + $0x38] sm:$0xff]  ;;  %v846_v11 = vld [vmem:[%s1128_s1 + $0x20] sm:$0xff]  ;;  %v851_v12 = vld [vmem:[%s1128_s1 + $0x28] sm:$0xff]  ;;  %s669_s20 = sshll.u32 %s758_s19, 4  ;;  %vm662_vm14 = vcmask 254976   ;;  %s670_s20 = int_to_ptr.vmem [resolvable:$true] %s669_s20 }
   0x7   :  { %162 = vmatpush.msra.mxu0 %v33_v7  ;;  %186 = vmatpush.msra.mxu1 %v832_v8  ;;  %v30_v10 = vld [vmem:[%s1128_s1 + $0x18] sm:$0xff]  ;;  %v27_v13 = vld [vmem:[%s1128_s1] sm:$0xff]  ;;  %v860_v14 = vld [vmem:[%s1128_s1 + $0x8] sm:$0xff] }
   0x8   :  { %212 = vmatpush.msra.mxu2 %v837_v9  ;;  %v866_v15 = vld [vmem:[%s1128_s1 + $0x10] sm:$0xff]  ;;  %v61_v26 = vld [vmem:[%s1130_s3 + $0x78] sm:$0xff]  ;;  %v59_v30 = vld [vmem:[%s1130_s3 + $0x68] sm:$0xff] }
   0x9   :  { %163 = vmatpush.msra.mxu0 %v30_v10  ;;  %187 = vmatpush.msra.mxu1 %v846_v11  ;;  %v60_v27 = vld [vmem:[%s1130_s3 + $0x70] sm:$0xff]  ;;  %v58_v32 = vld [vmem:[%s1130_s3 + $0x60] sm:$0xff]  ;;  %v57_v35 = vld [vmem:[%s1130_s3 + $0x58] sm:$0xff] }
   0xa   :  { %85 = vxpose.xlu0.b32.cont [2/4] (short) (narrow) %v81_v1, 16  ;;  %213 = vmatpush.msra.mxu2 %v851_v12  ;;  %v714_v18 = vpop.eup %713  ;;  %v56_v37 = vld [vmem:[%s1130_s3 + $0x50] sm:$0xff]  ;;  %v55_v40 = vld [vmem:[%s1130_s3 + $0x48] sm:$0xff]  ;;  %v54_v43 = vld [vmem:[%s1130_s3 + $0x40] sm:$0xff] }
   0xb   :  { %164 = vmatpush.msra.mxu0 %v27_v13  ;;  %188 = vmatpush.msra.mxu1 %v860_v14  ;;  %v127_v19 = vmul.f32 16.0, %v714_v18  ;;  %vm131_vm1 = vweird.f32 %v714_v18  ;;  %v53_v45 = vld [vmem:[%s1130_s3 + $0x38] sm:$0xff]  ;;  %v52_v46 = vld [vmem:[%s1130_s3 + $0x30] sm:$0xff]  ;;  %v51_v48 = vld [vmem:[%s1130_s3 + $0x28] sm:$0xff] }
   0xc   :  { %214 = vmatpush.msra.mxu2 %v866_v15  ;;  %229 = vmatpush.msra.mxu3 %v61_v26  ;;  %v50_v49 = vld [vmem:[%s1130_s3 + $0x20] sm:$0xff]  ;;  %v49_v51 = vld [vmem:[%s1130_s3 + $0x18] sm:$0xff]  ;;  %v48_v52 = vld [vmem:[%s1130_s3 + $0x10] sm:$0xff] }
   0xd   :  { %v128_v23 = vsub.f32 1.0, %v127_v19  ;;  %v47_v53 = vld [vmem:[%s1130_s3 + $0x8] sm:$0xff]  ;;  %v46_v54 = vld [vmem:[%s1130_s3] sm:$0xff] }
   0xe   :  { %449 = vmatpush.msrb.mxu2 %v36_v4  ;;  %230 = vmatpush.msra.mxu3 %v60_v27  ;;  %v938_v55 = vld [vmem:[%s1129_s2] sm:$0xff]  ;;  %v943_v57 = vld [vmem:[%s1129_s2 + $0x8] sm:$0xff]  ;;  %v956_v4 = vld [vmem:[%s1129_s2 + $0x38] sm:$0x1] }
   0xf   :  { %v129_v28 = vmul.f32 %v714_v18, %v128_v23  ;;  %v950_v63 = vld [vmem:[%s1129_s2 + $0x20] sm:$0xff] }
  0x10   :  { %450 = vmatpush.msrb.mxu2 %v33_v7  ;;  %231 = vmatpush.msra.mxu3 %v59_v30 }
  0x11   :  { %v130_v33 = vadd.f32 %v714_v18, %v129_v28 }
  0x12   :  { %86 = vxpose.xlu0.b32.cont [3/4] (short) (narrow) %v82_v2, 16  ;;  %451 = vmatpush.msrb.mxu2 %v30_v10 }
  0x13   :  { %232 = vmatpush.msra.mxu3 %v58_v32  ;;  %v891_v38 = vsel %vm131_vm1, %v714_v18, %v130_v33  ;;  %v694_v18 = vld [vmem:[%s1127_s0 + $0x28] sm:$0xff] }
  0x14   :  { %452 = vmatpush.msrb.mxu2 %v27_v13 }
  0x15   :  { %233 = vmatpush.msra.mxu3 %v57_v35 }
  0x17   :  { %234 = vmatpush.msra.mxu3 %v56_v37 }
  0x19   :  { %235 = vmatpush.msra.mxu3 %v55_v40 }
  0x1a   :  { %87 = vxpose.xlu0.b32.end [4/4] (short) (narrow) %v83_v3, 16 }
  0x1b   :  { %236 = vmatpush.msra.mxu3 %v54_v43 }
  0x1d   :  { %237 = vmatpush.msra.mxu3 %v53_v45 }
  0x1f   :  { %238 = vmatpush.msra.mxu3 %v52_v46 }
  0x21   :  { %239 = vmatpush.msra.mxu3 %v51_v48 }
  0x23   :  { %240 = vmatpush.msra.mxu3 %v50_v49 }
  0x25   :  { %241 = vmatpush.msra.mxu3 %v49_v51 }
  0x27   :  { %242 = vmatpush.msra.mxu3 %v48_v52 }
  0x29   :  { %243 = vmatpush.msra.mxu3 %v47_v53 }
  0x2b   :  { %244 = vmatpush.msra.mxu3 %v46_v54 }
  0xa6   :  { %v100_v17 = vpop.trf.xlu0 }
  0xa7   :  { %v117_v21 = vsel %vm116_vm0, %v100_v17, 0.0  ;;  %v137_v41 = vrot.slane %v100_v17, 7  ;;  %v693_v17 = vld [vmem:[%s1127_s0 + $0x20] sm:$0xff] }
  0xa8   :  { %381 = vxpose.xlu1.b32.start [1/4] (short) (narrow) %v693_v17, 16 }
  0xae   :  { %v101_v20 = vpop.trf.xlu0 }
  0xaf   :  { %v118_v22 = vsel %vm116_vm0, %v101_v20, 0.0  ;;  %v138_v47 = vrot.slane %v101_v20, 7  ;;  %v695_v20 = vld [vmem:[%s1127_s0 + $0x30] sm:$0xff] }
  0xb0   :  { %v119_v24 = vadd.f32 %v118_v22, %v117_v21  ;;  %382 = vxpose.xlu1.b32.cont [2/4] (short) (narrow) %v694_v18, 16  ;;  %v696_v22 = vld [vmem:[%s1127_s0 + $0x38] sm:$0xff] }
  0xb1   :  { %v139_v50 = vsel %vm136_vm2, %v137_v41, %v138_v47 }
  0xb2   :  { %v120_v25 = vrot.slane %v119_v24, 4 }
  0xb4   :  { %v121_v29 = vadd.f32 %v120_v25, %v119_v24 }
  0xb6   :  { %v122_v31 = vrot.slane %v121_v29, 2 }
  0xb8   :  { %v123_v34 = vadd.f32 %v122_v31, %v121_v29  ;;  %383 = vxpose.xlu1.b32.cont [3/4] (short) (narrow) %v695_v20, 16 }
  0xba   :  { %v124_v36 = vrot.slane %v123_v34, 1 }
  0xbc   :  { %v125_v39 = vadd.f32 %v124_v36, %v123_v34  ;;  %v62_v34 = vld [vmem:[%s1131_s4] sm:$0xf] }
  0xbd   :  { %689 = vmatpush.msk.msrb.mxu0 %vm314_vm5, %v62_v34  ;;  %706 = vmatpush.msk.msrb.mxu3 %vm314_vm5, %v62_v34  ;;  %v73_v34 = vld [vmem:[%s1132_s5 + $0x50] sm:$0xff] }
  0xbe   :  { %v133_v42 = vmul.f32 %v891_v38, %v125_v39 }
  0xc0   :  { %v141_v44 = vsel %vm136_vm2, %v133_v42, %v137_v41  ;;  %384 = vxpose.xlu1.b32.end [4/4] (short) (narrow) %v696_v22, 16 }
  0xc1   :  { %680 = vmatmul.msk.f32.vlgmr.msra.gmra.mxu0 %vm116_vm0, %v141_v44  ;;  %683 = vmatmul.msk.f32.vlgmr.msra.gmra.mxu1 %vm116_vm0, %v141_v44 }
  0xc2   :  { %686 = vmatmul.msk.f32.vlgmr.msra.gmra.mxu2 %vm116_vm0, %v141_v44  ;;  %499 = vmatpush.msra.mxu0 %v822_v6 }
  0xc3   :  { %517 = vmatpush.msra.mxu2 %v61_v26 }
  0xc4   :  { %500 = vmatpush.msra.mxu0 %v837_v9 }
  0xc5   :  { %518 = vmatpush.msra.mxu2 %v60_v27 }
  0xc6   :  { %501 = vmatpush.msra.mxu0 %v851_v12 }
  0xc7   :  { %519 = vmatpush.msra.mxu2 %v59_v30 }
  0xc8   :  { %502 = vmatpush.msra.mxu0 %v866_v15 }
  0xc9   :  { %681 = vmatmul.msk.f32.gmra.mxu0 %vm116_vm0, %v139_v50  ;;  %684 = vmatmul.msk.f32.gmra.mxu1 %vm116_vm0, %v139_v50 }
  0xca   :  { %687 = vmatmul.msk.f32.gmra.mxu2 %vm116_vm0, %v139_v50 }
  0xcb   :  { %520 = vmatpush.msra.mxu2 %v58_v32 }
  0xcd   :  { %521 = vmatpush.msra.mxu2 %v57_v35 }
  0xcf   :  { %522 = vmatpush.msra.mxu2 %v56_v37 }
  0xd1   :  { %682 = vmatmul.msk.f32.gmra.mxu0 %vm116_vm0, %v138_v47  ;;  %685 = vmatmul.msk.f32.gmra.mxu1 %vm116_vm0, %v138_v47 }
  0xd2   :  { %688 = vmatmul.msk.f32.gmra.mxu2 %vm116_vm0, %v138_v47 }
  0xd3   :  { %523 = vmatpush.msra.mxu2 %v55_v40 }
  0xd5   :  { %524 = vmatpush.msra.mxu2 %v54_v43 }
  0xd7   :  { %525 = vmatpush.msra.mxu2 %v53_v45 }
  0xd9   :  { %526 = vmatpush.msra.mxu2 %v52_v46 }
  0xdb   :  { %527 = vmatpush.msra.mxu2 %v51_v48 }
  0xdd   :  { %528 = vmatpush.msra.mxu2 %v50_v49 }
  0xdf   :  { %529 = vmatpush.msra.mxu2 %v49_v51 }
  0xe1   :  { %530 = vmatpush.msra.mxu2 %v48_v52 }
  0xe3   :  { %531 = vmatpush.msra.mxu2 %v47_v53 }
  0xe5   :  { %532 = vmatpush.msra.mxu2 %v46_v54 }
 0x13e   :  { %v166_v56 = vpop.f32.mrf.mxu0  ;;  %v190_v58 = vpop.f32.mrf.mxu1 }
 0x13f   :  { %v167_v59 = vadd.f32 %v166_v56, %v938_v55  ;;  %v191_v61 = vadd.f32 %v190_v58, %v943_v57 }
 0x141   :  { %v225_v60 = vperm.slane %v167_v59, 0 }
 0x143   :  { %v226_v62 = vmul.f32 %v225_v60, %v191_v61 }
 0x145   :  { %245 = vmatmul.f32.vlgmr.msra.gmra.mxu3 %v226_v62 }
 0x146   :  { %v169_v0 = vpop.f32.mrf.mxu0  ;;  %v193_v1 = vpop.f32.mrf.mxu1 }
 0x147   :  { %v194_v2 = vadd.f32 %v193_v1, %v950_v63 }
 0x149   :  { %v227_v3 = vmul.f32 %v225_v60, %v194_v2 }
 0x14d   :  { %248 = vmatmul.f32.gmra.mxu3 %v227_v3 }
 0x14e   :  { %v171_v7 = vpop.f32.mrf.mxu0  ;;  %v196_v10 = vpop.f32.mrf.mxu1 }
 0x14f   :  { %v197_v13 = vadd.f32 %v196_v10, %v956_v4  ;;  %v397_v10 = vpop.trf.xlu1 }
 0x151   :  { %v228_v16 = vmul.f32 %v225_v60, %v197_v13  ;;  %v413_v13 = vsel %vm116_vm0, %v397_v10, 0.0 }
 0x155   :  { %251 = vmatmul.f32.gmra.mxu3 %v228_v16 }
 0x157   :  { %v398_v16 = vpop.trf.xlu1 }
 0x158   :  { %v414_v17 = vsel %vm116_vm0, %v398_v16, 0.0 }
 0x159   :  { %v415_v18 = vadd.f32 %v414_v17, %v413_v13 }
 0x1c8   :  { %v246_v19 = vpop.f32.mrf.mxu3 }
 0x1c9   :  { %v256_v24 = vsel %vm255_vm3, %v246_v19, -inf }
 0x1d0   :  { %v249_v21 = vpop.f32.mrf.mxu3 }
 0x1d1   :  { %v257_v23 = vsel %vm255_vm3, %v249_v21, -inf }
 0x1d2   :  { %v260_v25 = vmax.f32 %v256_v24, %v257_v23  ;;  %v425_v24 = vrot.slane %v397_v10, 7 }
 0x1d8   :  { %v252_v26 = vpop.f32.mrf.mxu3 }
 0x1d9   :  { %v259_v27 = vsel %vm258_vm4, %v252_v26, -inf }
 0x1da   :  { %v261_v28 = vmax.f32 %v260_v25, %v259_v27  ;;  %v993_v27 = vld [vmem:[%s1132_s5 + $0x78] sm:$0xff] }
 0x1db   :  { %356 = vmatpush.msrb.mxu1 %v993_v27 }
 0x1dc   :  { %v262_v29 = vrot.slane %v261_v28, 4 }
 0x1de   :  { %v263_v30 = vmax.f32 %v261_v28, %v262_v29  ;;  %v998_v28 = vld [vmem:[%s1132_s5 + $0x70] sm:$0xff] }
 0x1df   :  { %357 = vmatpush.msrb.mxu1 %v998_v28 }
 0x1e0   :  { %v264_v31 = vrot.slane %v263_v30, 2 }
 0x1e2   :  { %v265_v32 = vmax.f32 %v263_v30, %v264_v31  ;;  %v1014_v30 = vrot.slane %v398_v16, 7  ;;  %v75_v31 = vld [vmem:[%s1132_s5 + $0x60] sm:$0xff] }
 0x1e4   :  { %v266_v33 = vrot.slane %v265_v32, 1 }
 0x1e6   :  { %v267_v35 = vmax.f32 %v265_v32, %v266_v33  ;;  %v1022_v32 = vsel %vm136_vm2, %v425_v24, %v1014_v30  ;;  %v74_v33 = vld [vmem:[%s1132_s5 + $0x58] sm:$0xff] }
 0x1e8   :  { %v268_v36 = vsub.f32 %v246_v19, %v267_v35  ;;  %v269_v37 = vsub.f32 %v249_v21, %v267_v35  ;;  %v270_v39 = vsub.f32 %v252_v26, %v267_v35  ;;  %v416_v19 = vrot.slane %v415_v18, 4  ;;  %v72_v35 = vld [vmem:[%s1132_s5 + $0x48] sm:$0xff] }
 0x1ea   :  { %v271_v40 = vmul.f32 1.442695, %v268_v36  ;;  %v273_v41 = vmul.f32 1.442695, %v269_v37  ;;  %v275_v42 = vmul.f32 1.442695, %v270_v39  ;;  %v417_v20 = vadd.f32 %v416_v19, %v415_v18 }
 0x1eb   :  { %v71_v36 = vld [vmem:[%s1132_s5 + $0x40] sm:$0xff]  ;;  %v70_v37 = vld [vmem:[%s1132_s5 + $0x38] sm:$0xff]  ;;  %v69_v39 = vld [vmem:[%s1132_s5 + $0x30] sm:$0xff] }
 0x1ec   :  { %715 = vpow2.f32 %v271_v40  ;;  %v418_v21 = vrot.slane %v417_v20, 2  ;;  %v68_v40 = vld [vmem:[%s1132_s5 + $0x28] sm:$0xff] }
 0x1ed   :  { %717 = vpow2.f32 %v273_v41  ;;  %v216_v41 = vpop.f32.mrf.mxu2 }
 0x1ee   :  { %719 = vpow2.f32 %v275_v42  ;;  %v419_v22 = vadd.f32 %v418_v21, %v417_v20  ;;  %v67_v42 = vld [vmem:[%s1132_s5 + $0x20] sm:$0xff] }
 0x1f0   :  { %v420_v23 = vrot.slane %v419_v22, 1 }
 0x1f2   :  { %v716_v43 = vpop.eup %715  ;;  %v421_v25 = vadd.f32 %v420_v23, %v419_v22 }
 0x1f3   :  { %v718_v44 = vpop.eup %717  ;;  %v277_v45 = vsel %vm255_vm3, %v716_v43, 0.0 }
 0x1f4   :  { %v720_v6 = vpop.eup %719  ;;  %v278_v46 = vsel %vm255_vm3, %v718_v44, 0.0  ;;  %v422_v26 = vmul.f32 %v421_v25, %v891_v38  ;;  %v1011_v38 = vld [vmem:[%s1132_s5 + $0x68] sm:$0xff] }
 0x1f5   :  { %v279_v47 = vadd.f32 %v278_v46, %v277_v45  ;;  %v280_v9 = vsel %vm258_vm4, %v720_v6, 0.0  ;;  %358 = vmatpush.msrb.mxu1 %v1011_v38  ;;  %v64_v45 = vld [vmem:[%s1132_s5 + $0x8] sm:$0xff] }
 0x1f6   :  { %v1001_v29 = vsel %vm136_vm2, %v422_v26, %v425_v24 }
 0x1f7   :  { %v281_v48 = vadd.f32 %v280_v9, %v279_v47  ;;  %697 = vmatmul.msk.f32.vlgmr.msrb.gmra.mxu2 %vm116_vm0, %v1001_v29  ;;  %359 = vmatpush.msrb.mxu1 %v75_v31  ;;  %v219_v47 = vpop.f32.mrf.mxu2 }
 0x1f9   :  { %v282_v49 = vrot.slane %v281_v48, 4  ;;  %360 = vmatpush.msrb.mxu1 %v74_v33 }
 0x1fb   :  { %v283_v50 = vadd.f32 %v282_v49, %v281_v48  ;;  %361 = vmatpush.msrb.mxu1 %v73_v34  ;;  %v1074_v48 = vld [vmem:[%s1129_s2 + $0x28] sm:$0xff]  ;;  %v1080_v49 = vld [vmem:[%s1129_s2 + $0x10] sm:$0xff] }
 0x1fd   :  { %v284_v51 = vrot.slane %v283_v50, 2  ;;  %362 = vmatpush.msrb.mxu1 %v72_v35 }
 0x1ff   :  { %v285_v12 = vadd.f32 %v284_v51, %v283_v50  ;;  %698 = vmatmul.msk.f32.gmra.mxu2 %vm116_vm0, %v1022_v32  ;;  %363 = vmatpush.msrb.mxu1 %v71_v36  ;;  %v220_v50 = vadd.f32 %v219_v47, %v1074_v48 }
 0x201   :  { %v286_v52 = vrot.slane %v285_v12, 1  ;;  %364 = vmatpush.msrb.mxu1 %v70_v37 }
 0x203   :  { %v287_v53 = vadd.f32 %v286_v52, %v285_v12  ;;  %365 = vmatpush.msrb.mxu1 %v69_v39 }
 0x205   :  { %721 = vrcp.f32 %v287_v53  ;;  %v299_v58 = vand.u32 2147483648, %v287_v53  ;;  %v297_v60 = vand.u32 2147483647, %v287_v53  ;;  %vm293_vm7 = vweird.f32 %v287_v53  ;;  %366 = vmatpush.msrb.mxu1 %v68_v40 }
 0x207   :  { %v300_v62 = vor.u32 1.1754944e-38, %v299_v58  ;;  %vm298_vm9 = vcmp.eq.f32.partialorder %v297_v60, 8.507059e+37  ;;  %699 = vmatmul.msk.f32.gmra.mxu2 %vm116_vm0, %v1014_v30  ;;  %367 = vmatpush.msrb.mxu1 %v67_v42 }
 0x20b   :  { %v722_v15 = vpop.eup %721 }
 0x20c   :  { %v289_v54 = vmul.f32 %v722_v15, %v287_v53  ;;  %vm294_vm6 = vweird.f32 %v722_v15 }
 0x20d   :  { %vm295_vm8 = vmor %vm293_vm7, %vm294_vm6 }
 0x20e   :  { %v290_v56 = vsub.f32 1.0, %v289_v54 }
 0x210   :  { %v291_v59 = vmul.f32 %v722_v15, %v290_v56 }
 0x212   :  { %v292_v61 = vadd.f32 %v722_v15, %v291_v59 }
 0x214   :  { %v296_v0 = vsel %vm295_vm8, %v722_v15, %v292_v61 }
 0x215   :  { %v301_v1 = vsel %vm298_vm9, %v300_v62, %v296_v0 }
 0x216   :  { %v302_v2 = vmul.f32 %v716_v43, %v301_v1  ;;  %v303_v3 = vmul.f32 %v718_v44, %v301_v1  ;;  %v304_v7 = vmul.f32 %v720_v6, %v301_v1  ;;  %v66_v43 = vld [vmem:[%s1132_s5 + $0x18] sm:$0xff]  ;;  %v65_v44 = vld [vmem:[%s1132_s5 + $0x10] sm:$0xff]  ;;  %v63_v6 = vld [vmem:[%s1132_s5] sm:$0xff] }
 0x217   :  { %368 = vmatpush.msrb.mxu1 %v66_v43 }
 0x218   :  { %690 = vmatmul.msk.f32.vlgmr.msrb.gmra.mxu0 %vm255_vm3, %v302_v2 }
 0x219   :  { %369 = vmatpush.msrb.mxu1 %v65_v44 }
 0x21b   :  { %370 = vmatpush.msrb.mxu1 %v64_v45 }
 0x21d   :  { %371 = vmatpush.msrb.mxu1 %v63_v6 }
 0x21f   :  { %473 = vmatpush.msra.mxu1 %v817_v5  ;;  %v1086_v5 = vld [vmem:[%s1129_s2 + $0x40] sm:$0x1] }
 0x220   :  { %691 = vmatmul.msk.f32.gmra.mxu0 %vm255_vm3, %v303_v3 }
 0x221   :  { %474 = vmatpush.msra.mxu1 %v832_v8  ;;  %v222_v8 = vpop.f32.mrf.mxu2 }
 0x222   :  { %v223_v12 = vadd.f32 %v222_v8, %v1086_v5 }
 0x223   :  { %475 = vmatpush.msra.mxu1 %v846_v11  ;;  %v217_v11 = vadd.f32 %v216_v41, %v1080_v49 }
 0x225   :  { %476 = vmatpush.msra.mxu1 %v860_v14 }
 0x228   :  { %692 = vmatmul.msk.f32.gmra.mxu0 %vm255_vm3, %v304_v7 }
 0x230   :  { %703 = vmatmul.msk.f32.vlgmr.msra.gmra.mxu0 %vm116_vm0, %v1001_v29 }
 0x238   :  { %704 = vmatmul.msk.f32.gmra.mxu0 %vm116_vm0, %v1022_v32 }
 0x240   :  { %705 = vmatmul.msk.f32.gmra.mxu0 %vm116_vm0, %v1014_v30 }
 0x27a   :  { %v454_v1 = vpop.f32.mrf.mxu2 }
 0x27b   :  { %v455_v10 = vadd.f32 %v454_v1, %v938_v55 }
 0x27d   :  { %v513_v16 = vperm.slane %v455_v10, 0 }
 0x282   :  { %v457_v2 = vpop.f32.mrf.mxu2 }
 0x28a   :  { %v459_v3 = vpop.f32.mrf.mxu2 }
 0x295   :  { %v335_v46 = vpop.f32.mrf.mxu0 }
 0x296   :  { %v344_v52 = vmul.f32 %v335_v46, %v217_v11 }
 0x29d   :  { %v338_v9 = vpop.f32.mrf.mxu0 }
 0x29e   :  { %v345_v51 = vmul.f32 %v338_v9, %v220_v50 }
 0x2a0   :  { %v347_v15 = vadd.f32 %v345_v51, %v344_v52 }
 0x2a5   :  { %v341_v14 = vpop.f32.mrf.mxu0 }
 0x2a6   :  { %v346_v53 = vmul.f32 %v341_v14, %v223_v12 }
 0x2a8   :  { %v348_v54 = vsel %vm136_vm2, %v346_v53, 0.0 }
 0x2a9   :  { %v349_v56 = vadd.f32 %v348_v54, %v347_v15 }
 0x2ab   :  { %v350_v58 = vrot.slane %v349_v56, 4 }
 0x2ad   :  { %v351_v59 = vadd.f32 %v350_v58, %v349_v56  ;;  %v504_v2 = vpop.f32.mrf.mxu0 }
 0x2af   :  { %v352_v60 = vrot.slane %v351_v59, 2 }
 0x2b1   :  { %v353_v61 = vadd.f32 %v352_v60, %v351_v59 }
 0x2b3   :  { %v354_v62 = vrot.slane %v353_v61, 1 }
 0x2b5   :  { %v355_v0 = vadd.f32 %v354_v62, %v353_v61  ;;  %v507_v10 = vpop.f32.mrf.mxu0 }
 0x2b7   :  { %372 = vmatmul.f32.vlgmr.msrb.gmra.mxu1 %v355_v0 }
 0x2b8   :  { %638 = vmatpush.msrb.mxu1 %v993_v27 }
 0x2ba   :  { %639 = vmatpush.msrb.mxu1 %v998_v28 }
 0x2bc   :  { %640 = vmatpush.msrb.mxu1 %v1011_v38 }
 0x2be   :  { %641 = vmatpush.msrb.mxu1 %v75_v31 }
 0x2bf   :  { %700 = vmatmul.msk.f32.vlgmr.msra.gmra.mxu1 %vm116_vm0, %v1001_v29 }
 0x2c0   :  { %642 = vmatpush.msrb.mxu1 %v74_v33 }
 0x2c2   :  { %643 = vmatpush.msrb.mxu1 %v73_v34 }
 0x2c4   :  { %644 = vmatpush.msrb.mxu1 %v72_v35 }
 0x2c6   :  { %645 = vmatpush.msrb.mxu1 %v71_v36 }
 0x2c7   :  { %701 = vmatmul.msk.f32.gmra.mxu1 %vm116_vm0, %v1022_v32 }
 0x2c8   :  { %646 = vmatpush.msrb.mxu1 %v70_v37 }
 0x2ca   :  { %647 = vmatpush.msrb.mxu1 %v69_v39 }
 0x2cc   :  { %648 = vmatpush.msrb.mxu1 %v68_v40 }
 0x2ce   :  { %649 = vmatpush.msrb.mxu1 %v67_v42 }
 0x2cf   :  { %702 = vmatmul.msk.f32.gmra.mxu1 %vm116_vm0, %v1014_v30 }
 0x2d0   :  { %650 = vmatpush.msrb.mxu1 %v66_v43 }
 0x2d2   :  { %651 = vmatpush.msrb.mxu1 %v65_v44 }
 0x2d4   :  { %652 = vmatpush.msrb.mxu1 %v64_v45 }
 0x2d6   :  { %653 = vmatpush.msrb.mxu1 %v63_v6 }
 0x334   :  { %v1100_v7 = vpop.f32.mrf.mxu1 }
 0x33c   :  { %v478_v13 = vpop.f32.mrf.mxu1 }
 0x33d   :  { %v479_v17 = vadd.f32 %v478_v13, %v943_v57 }
 0x33f   :  { %v514_v18 = vmul.f32 %v513_v16, %v479_v17  ;;  %v510_v17 = vpop.f32.mrf.mxu0 }
 0x341   :  { %533 = vmatmul.f32.vlgmr.msra.gmra.mxu2 %v514_v18  ;;  %v505_v18 = vadd.f32 %v504_v2, %v1080_v49 }
 0x344   :  { %v481_v19 = vpop.f32.mrf.mxu1 }
 0x345   :  { %v482_v20 = vadd.f32 %v481_v19, %v950_v63 }
 0x347   :  { %v515_v21 = vmul.f32 %v513_v16, %v482_v20  ;;  %v511_v20 = vadd.f32 %v510_v17, %v1086_v5 }
 0x349   :  { %536 = vmatmul.f32.gmra.mxu2 %v515_v21 }
 0x34c   :  { %v484_v22 = vpop.f32.mrf.mxu1 }
 0x34d   :  { %v485_v23 = vadd.f32 %v484_v22, %v956_v4 }
 0x34f   :  { %v516_v24 = vmul.f32 %v513_v16, %v485_v23  ;;  %v508_v16 = vadd.f32 %v507_v10, %v1074_v48  ;;  %v79_v48 = vld [vmem:[%s1133_s6] sm:$0x1] }
 0x351   :  { %539 = vmatmul.f32.gmra.mxu2 %v516_v24 }
 0x3c4   :  { %v534_v25 = vpop.f32.mrf.mxu2 }
 0x3c5   :  { %v543_v27 = vsel %vm255_vm3, %v534_v25, -inf }
 0x3cc   :  { %v537_v26 = vpop.f32.mrf.mxu2 }
 0x3cd   :  { %v544_v55 = vsel %vm255_vm3, %v537_v26, -inf }
 0x3ce   :  { %v546_v28 = vmax.f32 %v543_v27, %v544_v55 }
 0x3d4   :  { %v540_v57 = vpop.f32.mrf.mxu2 }
 0x3d5   :  { %v545_v29 = vsel %vm258_vm4, %v540_v57, -inf }
 0x3d6   :  { %v547_v38 = vmax.f32 %v546_v28, %v545_v29 }
 0x3d8   :  { %v548_v30 = vrot.slane %v547_v38, 4 }
 0x3da   :  { %v549_v63 = vmax.f32 %v547_v38, %v548_v30  ;;  %v374_v30 = vadd.f32 %v1100_v7, %v79_v48 }
 0x3dc   :  { %v550_v31 = vrot.slane %v549_v63, 2 }
 0x3de   :  { %v551_v32 = vmax.f32 %v549_v63, %v550_v31 }
 0x3e0   :  { %v552_v33 = vrot.slane %v551_v32, 1 }
 0x3e2   :  { %v553_v34 = vmax.f32 %v551_v32, %v552_v33 }
 0x3e4   :  { %v554_v4 = vsub.f32 %v534_v25, %v553_v34  ;;  %v555_v35 = vsub.f32 %v537_v26, %v553_v34  ;;  %v556_v36 = vsub.f32 %v540_v57, %v553_v34 }
 0x3e6   :  { %v557_v37 = vmul.f32 1.442695, %v554_v4  ;;  %v559_v39 = vmul.f32 1.442695, %v555_v35  ;;  %v561_v40 = vmul.f32 1.442695, %v556_v36 }
 0x3e8   :  { %723 = vpow2.f32 %v557_v37 }
 0x3e9   :  { %725 = vpow2.f32 %v559_v39 }
 0x3ea   :  { %727 = vpow2.f32 %v561_v40 }
 0x3ee   :  { %v724_v41 = vpop.eup %723 }
 0x3ef   :  { %v726_v42 = vpop.eup %725  ;;  %v563_v43 = vsel %vm255_vm3, %v724_v41, 0.0 }
 0x3f0   :  { %v728_v44 = vpop.eup %727  ;;  %v564_v45 = vsel %vm255_vm3, %v726_v42, 0.0 }
 0x3f1   :  { %v565_v6 = vadd.f32 %v564_v45, %v563_v43  ;;  %v566_v46 = vsel %vm258_vm4, %v728_v44, 0.0 }
 0x3f3   :  { %v567_v47 = vadd.f32 %v566_v46, %v565_v6 }
 0x3f5   :  { %v568_v9 = vrot.slane %v567_v47, 4 }
 0x3f7   :  { %v569_v50 = vadd.f32 %v568_v9, %v567_v47 }
 0x3f9   :  { %v570_v8 = vrot.slane %v569_v50, 2 }
 0x3fb   :  { %v571_v11 = vadd.f32 %v570_v8, %v569_v50 }
 0x3fd   :  { %v572_v51 = vrot.slane %v571_v11, 1 }
 0x3ff   :  { %v573_v12 = vadd.f32 %v572_v51, %v571_v11 }
 0x401   :  { %729 = vrcp.f32 %v573_v12  ;;  %v585_v15 = vand.u32 2147483648, %v573_v12  ;;  %v583_v56 = vand.u32 2147483647, %v573_v12  ;;  %vm579_vm11 = vweird.f32 %v573_v12 }
 0x403   :  { %v586_v59 = vor.u32 1.1754944e-38, %v585_v15  ;;  %vm584_vm13 = vcmp.eq.f32.partialorder %v583_v56, 8.507059e+37 }
 0x407   :  { %v730_v52 = vpop.eup %729 }
 0x408   :  { %v575_v14 = vmul.f32 %v730_v52, %v573_v12  ;;  %vm580_vm10 = vweird.f32 %v730_v52 }
 0x409   :  { %vm581_vm12 = vmor %vm579_vm11, %vm580_vm10 }
 0x40a   :  { %v576_v53 = vsub.f32 1.0, %v575_v14 }
 0x40c   :  { %v577_v54 = vmul.f32 %v730_v52, %v576_v53 }
 0x40e   :  { %v578_v58 = vadd.f32 %v730_v52, %v577_v54 }
 0x410   :  { %v582_v60 = vsel %vm581_vm12, %v730_v52, %v578_v58 }
 0x411   :  { %v587_v61 = vsel %vm584_vm13, %v586_v59, %v582_v60 }
 0x412   :  { %v588_v62 = vmul.f32 %v724_v41, %v587_v61  ;;  %v589_v0 = vmul.f32 %v726_v42, %v587_v61  ;;  %v590_v1 = vmul.f32 %v728_v44, %v587_v61 }
 0x414   :  { %707 = vmatmul.msk.f32.vlgmr.msrb.gmra.mxu3 %vm255_vm3, %v588_v62 }
 0x41c   :  { %708 = vmatmul.msk.f32.gmra.mxu3 %vm255_vm3, %v589_v0 }
 0x424   :  { %709 = vmatmul.msk.f32.gmra.mxu3 %vm255_vm3, %v590_v1 }
 0x497   :  { %v617_v3 = vpop.f32.mrf.mxu3 }
 0x498   :  { %v626_v21 = vmul.f32 %v617_v3, %v505_v18 }
 0x49f   :  { %v620_v13 = vpop.f32.mrf.mxu3 }
 0x4a0   :  { %v627_v19 = vmul.f32 %v620_v13, %v508_v16 }
 0x4a2   :  { %v629_v24 = vadd.f32 %v627_v19, %v626_v21 }
 0x4a7   :  { %v623_v22 = vpop.f32.mrf.mxu3 }
 0x4a8   :  { %v628_v23 = vmul.f32 %v623_v22, %v511_v20 }
 0x4aa   :  { %v630_v25 = vsel %vm136_vm2, %v628_v23, 0.0 }
 0x4ab   :  { %v631_v26 = vadd.f32 %v630_v25, %v629_v24 }
 0x4ad   :  { %v632_v55 = vrot.slane %v631_v26, 4 }
 0x4af   :  { %v633_v27 = vadd.f32 %v632_v55, %v631_v26 }
 0x4b1   :  { %v634_v28 = vrot.slane %v633_v27, 2 }
 0x4b3   :  { %v635_v57 = vadd.f32 %v634_v28, %v633_v27 }
 0x4b5   :  { %v636_v29 = vrot.slane %v635_v57, 1 }
 0x4b7   :  { %v637_v38 = vadd.f32 %v636_v29, %v635_v57 }
 0x4b9   :  { %654 = vmatmul.f32.vlgmr.msrb.gmra.mxu1 %v637_v38 }
 0x536   :  { %v655_v49 = vpop.f32.mrf.mxu1 }
 0x537   :  { %v656_v5 = vadd.f32 %v655_v49, %v79_v48 }
 0x539   :  { %v659_v63 = vrot.slane %v656_v5, 7 }
 0x53b   :  { %v661_v31 = vsel %vm136_vm2, %v374_v30, %v659_v63 }
 0x53c   :  { %663 = vst.msk [vmem:[#allocation2] sm:$0x3] %vm662_vm14, %v661_v31 }
 0x53d   :  { %674 = dma.vmem_to_hbm [thread:$0]  %s670_s20, 32, %s672_s22, [#allocation3]  }
 0x53e   :  { %755 = dma.done.wait [#allocation3], 32  }
 0x53f   :  { %756 = vsyncadd [#allocation3], 4294967264 }
 0x540   :  { %679 = vsyncpa [#allocation3], 1 }

</bundles_post_ra>
